<compile_context>
chip_gen: v6e
topology: v6e:2x2x1
jax: 0.10.0
libtpu: 0.0.40
codegen_flags: <defaults>
</compile_context>

<pallas_src>
import functools

import jax
import jax.numpy as jnp
from jax.experimental import pallas as pl
from jax.experimental.pallas import tpu as pltpu


def _round_up(x, m):
    return (x + m - 1) // m * m


def _actor_kernel(x_ref, w1_ref, b1_ref, w2_ref, b2_ref, w3_ref, b3_ref, out_ref):
    # In-kernel f32 -> bf16 cast (VPU filler, hidden under DMA/MXU).
    x = x_ref[...].astype(jnp.bfloat16)
    # lin1 + relu : (tile_b, num_inputs) @ (num_inputs, 32), f32 accumulate.
    h1 = jnp.dot(x, w1_ref[...], preferred_element_type=jnp.float32)
    h1 = jnp.maximum(h1 + b1_ref[...], 0.0)
    # lin2 + relu : (tile_b, 32) @ (32, 16)
    h2 = jnp.dot(h1.astype(jnp.bfloat16), w2_ref[...],
                 preferred_element_type=jnp.float32)
    h2 = jnp.maximum(h2 + b2_ref[...], 0.0)
    # lin3 (no activation) : (tile_b, 16) @ (16, num_actions)
    h3 = jnp.dot(h2.astype(jnp.bfloat16), w3_ref[...],
                 preferred_element_type=jnp.float32)
    # Narrow (num_actions-wide) store; masked vst is far cheaper than the
    # 128-lane f32 writeback it replaces.
    out_ref[...] = (h3 + b3_ref[...]).astype(out_ref.dtype)


def prepare_actor_params(w1, b1, w2, b2, w3, b3):
    """One-time parameter prep (hoisted out of the hot forward path).

    Casts weights to bf16 for the MXU and reshapes biases to (1, N) f32.
    Weights are stored (in, out):  y = x @ W + b  (== PyTorch x @ W.T + b).
    """
    bf16 = jnp.bfloat16
    return (
        w1.astype(bf16), b1.astype(jnp.float32).reshape(1, -1),
        w2.astype(bf16), b2.astype(jnp.float32).reshape(1, -1),
        w3.astype(bf16), b3.astype(jnp.float32).reshape(1, -1),
    )


@functools.partial(jax.jit, static_argnames=("tile_b",))
def actor_forward(x, w1, b1, w2, b2, w3, b3, *, tile_b=None):
    """Actor forward pass in a single batch-tiled Pallas kernel.

    x:  (B, num_inputs) float32
    w1: (num_inputs, 32) bf16, b1: (1, 32) f32
    w2: (32, 16)        bf16, b2: (1, 16) f32
    w3: (16, A)         bf16, b3: (1, A)  f32    (A = num_actions)
    (use prepare_actor_params to produce the weight/bias layout)
    Returns (B, num_actions) float32.
    """
    B, num_inputs = x.shape
    h1_dim = w1.shape[1]          # 32
    h2_dim = w2.shape[1]          # 16
    num_actions = w3.shape[1]

    # Batch tiling: large tiles to amortize the ~0.35us/step pipeline overhead,
    # but keep >= 2 grid steps so v7x's 2 TensorCores both get work.
    if tile_b is None:
        tile_b = 4096
        while tile_b > 8 and pl.cdiv(B, tile_b) < 2:
            tile_b //= 2
    tile_b = max(8, _round_up(int(tile_b), 8))
    b_pad = _round_up(B, tile_b)

    xp = x
    if b_pad != B:
        xp = jnp.pad(x, ((0, b_pad - B), (0, 0)))

    grid = (b_pad // tile_b,)

    flops = 2 * b_pad * (num_inputs * h1_dim + h1_dim * h2_dim
                         + h2_dim * num_actions)
    bytes_accessed = (
        b_pad * num_inputs * 4                      # x (f32)
        + b_pad * num_actions * 4                   # out (f32)
        + (w1.size + w2.size + w3.size) * 2         # weights (bf16)
        + (b1.size + b2.size + b3.size) * 4)        # biases (f32)

    out = pl.pallas_call(
        _actor_kernel,
        out_shape=jax.ShapeDtypeStruct((b_pad, num_actions), jnp.float32),
        grid=grid,
        in_specs=[
            # x: streamed per batch tile (last block dim == full array dim).
            pl.BlockSpec((tile_b, num_inputs), lambda i: (i, 0)),
            # Weights / biases: unpadded full-array blocks with constant
            # index_maps -> DMA'd once, VMEM-resident across the grid.
            pl.BlockSpec((num_inputs, h1_dim), lambda i: (0, 0)),
            pl.BlockSpec((1, h1_dim), lambda i: (0, 0)),
            pl.BlockSpec((h1_dim, h2_dim), lambda i: (0, 0)),
            pl.BlockSpec((1, h2_dim), lambda i: (0, 0)),
            pl.BlockSpec((h2_dim, num_actions), lambda i: (0, 0)),
            pl.BlockSpec((1, num_actions), lambda i: (0, 0)),
        ],
        # Unpadded output: (tile_b, num_actions) block, contiguous in HBM.
        out_specs=pl.BlockSpec((tile_b, num_actions), lambda i: (i, 0)),
        compiler_params=pltpu.CompilerParams(
            dimension_semantics=("parallel",),
        ),
        cost_estimate=pl.CostEstimate(
            flops=flops, transcendentals=0, bytes_accessed=bytes_accessed),
    )(xp, w1, b1, w2, b2, w3, b3)

    if b_pad != B:
        out = out[:B]
    return out


def actor_forward_xla(x, w1, b1, w2, b2, w3, b3):
    """Plain fused XLA path — preferable for tiny per-call batches (< ~1k rows)
    where pallas_call launch/step overhead dominates."""
    h = jnp.maximum(x @ w1.astype(x.dtype) + b1, 0.0)
    h = jnp.maximum(h @ w2.astype(x.dtype) + b2, 0.0)
    return h @ w3.astype(x.dtype) + b3


def init_actor_params(key, num_inputs, num_actions):
    """PyTorch nn.Linear-style init: U(-1/sqrt(fan_in), 1/sqrt(fan_in))."""
    def linear(k, fan_in, fan_out):
        kw, kb = jax.random.split(k)
        bound = 1.0 / jnp.sqrt(float(fan_in))
        w = jax.random.uniform(kw, (fan_in, fan_out), jnp.float32, -bound, bound)
        b = jax.random.uniform(kb, (fan_out,), jnp.float32, -bound, bound)
        return w, b

    k1, k2, k3 = jax.random.split(key, 3)
    w1, b1 = linear(k1, num_inputs, 32)
    w2, b2 = linear(k2, 32, 16)
    w3, b3 = linear(k3, 16, num_actions)
    return w1, b1, w2, b2, w3, b3


def actor_reference_f32(x, w1, b1, w2, b2, w3, b3):
    h = jnp.maximum(x @ w1 + b1, 0.0)
    h = jnp.maximum(h @ w2 + b2, 0.0)
    return h @ w3 + b3


def actor_reference_bf16(x, w1, b1, w2, b2, w3, b3):
    """Mirrors the kernel's bf16-input / f32-accumulate matmul numerics."""
    c = lambda a: a.astype(jnp.bfloat16).astype(jnp.float32)
    h = jnp.maximum(c(x) @ c(w1) + b1, 0.0)
    h = jnp.maximum(c(h) @ c(w2) + b2, 0.0)
    return c(h) @ c(w3) + b3


if __name__ == "__main__":
    key = jax.random.PRNGKey(0)
    k_params, k_x = jax.random.split(key)

    batch = 24          # small demo batch
    num_inputs = 16
    num_actions = 4

    params = init_actor_params(k_params, num_inputs, num_actions)
    prepped = prepare_actor_params(*params)
    x = jax.random.normal(k_x, (batch, num_inputs), jnp.float32)

    # Explicit small tile: grid of 3 batch tiles, no batch padding.
    out = actor_forward(x, *prepped, tile_b=8)
    out = jax.block_until_ready(out)
    assert out.shape == (batch, num_actions), out.shape

    # Default heuristic tile: also exercises the batch-padding path
    # (tile_b=16 -> b_pad=32, 2 grid steps for the v7x 2-TC split).
    out_auto = jax.block_until_ready(actor_forward(x, *prepped))
    assert out_auto.shape == (batch, num_actions), out_auto.shape

    # Tight check against a reference with the same bf16-matmul numerics.
    ref_bf16 = actor_reference_bf16(x, *params)
    assert jnp.allclose(out, ref_bf16, atol=1e-3, rtol=1e-3), "mismatch vs bf16 ref"
    assert jnp.allclose(out_auto, ref_bf16, atol=1e-3, rtol=1e-3), "auto-tile mismatch"

    # Loose sanity check against the exact f32 PyTorch-semantics reference.
    ref_f32 = actor_reference_f32(x, *params)
    assert jnp.allclose(out, ref_f32, atol=1e-1, rtol=1e-1), "mismatch vs f32 ref"

    print("KERNEL_OK")
</pallas_src>

<mosaic_0001>
module attributes {stable_mosaic.version = 11 : i64} {
  func.func @_actor_kernel(%arg0: i32, %arg1: memref<8x16xf32, #tpu.memory_space<vmem>>, %arg2: memref<16x32xbf16, #tpu.memory_space<vmem>>, %arg3: memref<1x32xf32, #tpu.memory_space<vmem>>, %arg4: memref<32x16xbf16, #tpu.memory_space<vmem>>, %arg5: memref<1x16xf32, #tpu.memory_space<vmem>>, %arg6: memref<16x4xbf16, #tpu.memory_space<vmem>>, %arg7: memref<1x4xf32, #tpu.memory_space<vmem>>, %arg8: memref<8x4xf32, #tpu.memory_space<vmem>>) attributes {dimension_semantics = [#tpu.dimension_semantics<parallel>], iteration_bounds = array<i64: 3>, scalar_prefetch = 0 : i64, scratch_operands = 0 : i64, tpu.core_type = #tpu.core_type<tc>, window_params = [{transform_indices = @transform_0, window_bounds = array<i64: 8, 16>}, {pipeline_mode = #tpu.pipeline_mode<synchronous>, transform_indices = @transform_1, window_bounds = array<i64: 16, 32>}, {pipeline_mode = #tpu.pipeline_mode<synchronous>, transform_indices = @transform_2, window_bounds = array<i64: 1, 32>}, {pipeline_mode = #tpu.pipeline_mode<synchronous>, transform_indices = @transform_3, window_bounds = array<i64: 32, 16>}, {pipeline_mode = #tpu.pipeline_mode<synchronous>, transform_indices = @transform_4, window_bounds = array<i64: 1, 16>}, {pipeline_mode = #tpu.pipeline_mode<synchronous>, transform_indices = @transform_5, window_bounds = array<i64: 16, 4>}, {pipeline_mode = #tpu.pipeline_mode<synchronous>, transform_indices = @transform_6, window_bounds = array<i64: 1, 4>}, {transform_indices = @transform_7, window_bounds = array<i64: 8, 4>}]} {
    %c0 = arith.constant 0 : index
    %c0_0 = arith.constant 0 : index
    %0 = vector.load %arg1[%c0, %c0_0] : memref<8x16xf32, #tpu.memory_space<vmem>>, vector<8x16xf32>
    %1 = arith.truncf %0 : vector<8x16xf32> to vector<8x16xbf16>
    %c0_1 = arith.constant 0 : index
    %c0_2 = arith.constant 0 : index
    %2 = vector.load %arg2[%c0_1, %c0_2] : memref<16x32xbf16, #tpu.memory_space<vmem>>, vector<16x32xbf16>
    %cst = arith.constant dense<0.000000e+00> : vector<8x32xf32>
    %3 = tpu.matmul %1, %2, %cst {dimension_numbers = #tpu.dot_dimension_numbers<[1], [0], [0], [1], [0, 0, 1, 1], [], []>} : vector<8x16xbf16>, vector<16x32xbf16>, vector<8x32xf32> -> vector<8x32xf32>
    %c0_3 = arith.constant 0 : index
    %c0_4 = arith.constant 0 : index
    %4 = vector.load %arg3[%c0_3, %c0_4] : memref<1x32xf32, #tpu.memory_space<vmem>>, vector<1x32xf32>
    %5 = vector.broadcast %4 : vector<1x32xf32> to vector<8x32xf32>
    %6 = arith.addf %3, %5 : vector<8x32xf32>
    %cst_5 = arith.constant 0.000000e+00 : f32
    %7 = vector.broadcast %cst_5 : f32 to vector<8x32xf32>
    %8 = arith.maximumf %6, %7 : vector<8x32xf32>
    %9 = arith.truncf %8 : vector<8x32xf32> to vector<8x32xbf16>
    %c0_6 = arith.constant 0 : index
    %c0_7 = arith.constant 0 : index
    %10 = vector.load %arg4[%c0_6, %c0_7] : memref<32x16xbf16, #tpu.memory_space<vmem>>, vector<32x16xbf16>
    %cst_8 = arith.constant dense<0.000000e+00> : vector<8x16xf32>
    %11 = tpu.matmul %9, %10, %cst_8 {dimension_numbers = #tpu.dot_dimension_numbers<[1], [0], [0], [1], [0, 0, 1, 1], [], []>} : vector<8x32xbf16>, vector<32x16xbf16>, vector<8x16xf32> -> vector<8x16xf32>
    %c0_9 = arith.constant 0 : index
    %c0_10 = arith.constant 0 : index
    %12 = vector.load %arg5[%c0_9, %c0_10] : memref<1x16xf32, #tpu.memory_space<vmem>>, vector<1x16xf32>
    %13 = vector.broadcast %12 : vector<1x16xf32> to vector<8x16xf32>
    %14 = arith.addf %11, %13 : vector<8x16xf32>
    %cst_11 = arith.constant 0.000000e+00 : f32
    %15 = vector.broadcast %cst_11 : f32 to vector<8x16xf32>
    %16 = arith.maximumf %14, %15 : vector<8x16xf32>
    %17 = arith.truncf %16 : vector<8x16xf32> to vector<8x16xbf16>
    %c0_12 = arith.constant 0 : index
    %c0_13 = arith.constant 0 : index
    %18 = vector.load %arg6[%c0_12, %c0_13] : memref<16x4xbf16, #tpu.memory_space<vmem>>, vector<16x4xbf16>
    %cst_14 = arith.constant dense<0.000000e+00> : vector<8x4xf32>
    %19 = tpu.matmul %17, %18, %cst_14 {dimension_numbers = #tpu.dot_dimension_numbers<[1], [0], [0], [1], [0, 0, 1, 1], [], []>} : vector<8x16xbf16>, vector<16x4xbf16>, vector<8x4xf32> -> vector<8x4xf32>
    %c0_15 = arith.constant 0 : index
    %c0_16 = arith.constant 0 : index
    %20 = vector.load %arg7[%c0_15, %c0_16] : memref<1x4xf32, #tpu.memory_space<vmem>>, vector<1x4xf32>
    %21 = vector.broadcast %20 : vector<1x4xf32> to vector<8x4xf32>
    %22 = arith.addf %19, %21 : vector<8x4xf32>
    %c0_17 = arith.constant 0 : index
    %c0_18 = arith.constant 0 : index
    %23 = vector.load %arg8[%c0_17, %c0_18] : memref<8x4xf32, #tpu.memory_space<vmem>>, vector<8x4xf32>
    tpu.vector_store %arg8[%c0_17, %c0_18], %22 {strides = array<i32>} : memref<8x4xf32, #tpu.memory_space<vmem>>, vector<8x4xf32>,
    return
  }
  func.func @transform_0(%arg0: i32) -> (i32, i32) {
    %c0_i32 = arith.constant 0 : i32
    %c0_i32_0 = arith.constant 0 : i32
    return %arg0, %c0_i32 : i32, i32
  }
  func.func @transform_1(%arg0: i32) -> (i32, i32) {
    %c0_i32 = arith.constant 0 : i32
    %c0_i32_0 = arith.constant 0 : i32
    %c0_i32_1 = arith.constant 0 : i32
    return %c0_i32, %c0_i32_0 : i32, i32
  }
  func.func @transform_2(%arg0: i32) -> (i32, i32) {
    %c0_i32 = arith.constant 0 : i32
    %c0_i32_0 = arith.constant 0 : i32
    %c0_i32_1 = arith.constant 0 : i32
    return %c0_i32, %c0_i32_0 : i32, i32
  }
  func.func @transform_3(%arg0: i32) -> (i32, i32) {
    %c0_i32 = arith.constant 0 : i32
    %c0_i32_0 = arith.constant 0 : i32
    %c0_i32_1 = arith.constant 0 : i32
    return %c0_i32, %c0_i32_0 : i32, i32
  }
  func.func @transform_4(%arg0: i32) -> (i32, i32) {
    %c0_i32 = arith.constant 0 : i32
    %c0_i32_0 = arith.constant 0 : i32
    %c0_i32_1 = arith.constant 0 : i32
    return %c0_i32, %c0_i32_0 : i32, i32
  }
  func.func @transform_5(%arg0: i32) -> (i32, i32) {
    %c0_i32 = arith.constant 0 : i32
    %c0_i32_0 = arith.constant 0 : i32
    %c0_i32_1 = arith.constant 0 : i32
    return %c0_i32, %c0_i32_0 : i32, i32
  }
  func.func @transform_6(%arg0: i32) -> (i32, i32) {
    %c0_i32 = arith.constant 0 : i32
    %c0_i32_0 = arith.constant 0 : i32
    %c0_i32_1 = arith.constant 0 : i32
    return %c0_i32, %c0_i32_0 : i32, i32
  }
  func.func @transform_7(%arg0: i32) -> (i32, i32) {
    %c0_i32 = arith.constant 0 : i32
    %c0_i32_0 = arith.constant 0 : i32
    return %arg0, %c0_i32 : i32, i32
  }
}

</mosaic_0001>

<bundles_post_ra>
// kernel: actor_forward.1
= control target key start
LH: loop header
LB: loop body
LE: loop exit
PB: predicated region body
PF: predicated region fallthrough
CT: control target
= control target key end

     0   :  { %s630_s24 = smov 0   ;;  %s677_s0 = inlined_call_operand.vmem [shape: f32[24,16], index: 0, kind: input, shape index: {}]   ;;  %s678_s1 = inlined_call_operand.vmem [shape: bf16[16,32], index: 1, kind: input, shape index: {}]   ;;  %s679_s2 = inlined_call_operand.vmem [shape: f32[1,32], index: 2, kind: input, shape index: {}]   ;;  %s680_s3 = inlined_call_operand.vmem [shape: bf16[32,16], index: 3, kind: input, shape index: {}]   ;;  %s681_s4 = inlined_call_operand.vmem [shape: f32[1,16], index: 4, kind: input, shape index: {}]   ;;  %s682_s5 = inlined_call_operand.vmem [shape: bf16[16,4], index: 5, kind: input, shape index: {}]   ;;  %s683_s6 = inlined_call_operand.vmem [shape: f32[1,4], index: 6, kind: input, shape index: {}]   ;;  %s684_s7 = inlined_call_operand.vmem [shape: f32[24,4], index: 7, kind: output, shape index: {}]  }
   0x1 LB: > { %s520_s25 = sadd.s32 4294967295, %s586_s24   ;;  %p524_p0 = scmp.ge.s32.totalorder %s586_s24, 1  ;;  %s586_s24 = sphi %s630_s24, %s17_s24  }
   0x2   : > { %p236_p1 = scmp.lt.s32.totalorder %s586_s24, 4 }
   0x4   : > { %p237_p2 = pnand %p524_p0, %p236_p1 }
   0x5   : > { %p266_p3 = scmp.lt.s32.totalorder (!%p237_p2), %s520_s25, 2 }
   0x6   : > { %240 = sbr.rel (%p237_p2) target bundleno = 614 (0x266), region = 48 }
   0xb   : > { %v576_v0 = vld [vmem:[%s678_s1] sm:$0xff]   ;;  %v588_v1 = vmov 0.0   ;;  %vm589_vm0 = vmmov 0   ;;  %s686_s25 = smov (!%p266_p3, %s520_s25), 2  ;;  %vm292_vm1 = vcmask 130048   ;;  %v577_v4 = vld [vmem:[%s680_s3 + $0x8] sm:$0xff]  }
   0xc   : > { %546 = vmatprep.subr.bf16.mxu0 %v588_v1  ;;  %552 = vmatprep.subr.bf16.mxu1 %v588_v1  ;;  %s525_s28 = sshll.u32 %s686_s25, 3  ;;  %v578_v5 = vld [vmem:[%s680_s3] sm:$0xff]   ;;  %vm361_vm2 = vcmask 261120   ;;  %vm465_vm3 = vcmask 31744  }
   0xd   : > { %547 = vmatpush3.bf16.msra.mxu0 %v576_v0  ;;  %548 = vmatprep.mubr.msk.bf16.mxu0 %vm589_vm0, %v588_v1  ;;  %s269_s8 = scalar_lea.vmem %s677_s0, %s525_s28  ;;  %v579_v6 = vld [vmem:[%s682_s5] sm:$0xff]   ;;  %s273_s23 = scalar_lea.vmem %s684_s7, %s525_s28 }
   0xe   : > { %556 = vmatprep.mubr.msk.bf16.mxu1 %vm589_vm0, %v588_v1  ;;  %560 = vmatprep.subr.bf16.mxu0 %v588_v1  ;;  %v275_v2 = vld [vmem:[%s269_s8] sm:$0xff] }
   0xf   : > { %v276_v3 = vpack.c.bf16 %v275_v2, %v275_v2  ;;  %553 = vmatpush3.bf16.msra.mxu1 %v577_v4  ;;  %v527_v7 = vld [vmem:[%s679_s2] ss:$0 sm:$0xff] }
  0x10   : > { %554 = vmatprep.subr.bf16.mxu1 %v588_v1  ;;  %v530_v15 = vld [vmem:[%s681_s4] ss:$0 sm:$0xff] }
  0x11   : > { %549 = vmatmul.mubr.msk.bf16.vlgmr.msra.gmra.mxu0 %vm292_vm1, %v276_v3  ;;  %v534_v23 = vld [vmem:[%s683_s6] ss:$0 sm:$0xff] }
  0x12   : > { %562 = vmatprep.mubr.msk.bf16.mxu0 %vm589_vm0, %v588_v1  ;;  %561 = vmatpush3.bf16.msra.mxu0 %v579_v6 }
  0x13   : > { %555 = vmatpush3.bf16.msra.mxu1 %v578_v5 }
  0xd1   : > { %v330_v8 = vpop.f32.mrf.mxu0 }
  0xd2   : > { %v331_v9 = vadd.f32 %v527_v7, %v330_v8 }
  0xd3   : > { %v550_v10 = vpop.f32.mrf.mxu0 }
  0xd4   : > { %v336_v11 = vmax.f32 %v331_v9, 0.0 }
  0xd5   : > { %v333_v12 = vpop.f32.mrf.mxu0 }
  0xd6   : > { %v337_v13 = vpack.c.bf16 %v336_v11, %v336_v11 }
  0xd7   : > { %v551_v14 = vpop.f32.mrf.mxu0 }
  0xd8   : > { %557 = vmatmul.mubr.msk.bf16.vlgmr.msra.gmra.mxu1 %vm361_vm2, %v337_v13 }
 0x198   : > { %v399_v16 = vpop.f32.mrf.mxu1 }
 0x199   : > { %v400_v17 = vadd.f32 %v530_v15, %v399_v16 }
 0x19a   : > { %v558_v18 = vpop.f32.mrf.mxu1 }
 0x19b   : > { %v405_v19 = vmax.f32 %v400_v17, 0.0 }
 0x19c   : > { %v402_v20 = vpop.f32.mrf.mxu1 }
 0x19d   : > { %v406_v21 = vpack.c.bf16 %v405_v19, %v405_v19 }
 0x19e   : > { %v559_v22 = vpop.f32.mrf.mxu1 }
 0x19f   : > { %563 = vmatmul.mubr.msk.bf16.vlgmr.msra.gmra.mxu0 %vm292_vm1, %v406_v21 }
 0x25f   : > { %v459_v24 = vpop.f32.mrf.mxu0 }
 0x260   : > { %v460_v25 = vadd.f32 %v534_v23, %v459_v24 }
 0x261   : > { %v564_v26 = vpop.f32.mrf.mxu0 }
 0x262   : > { %466 = vst.msk [vmem:[%s273_s23] sm:$0xff] %vm465_vm3, %v460_v25 }
 0x263   : > { %v462_v27 = vpop.f32.mrf.mxu0 }
 0x265   : > { %v565_v28 = vpop.f32.mrf.mxu0 }
 0x266 PF: > { %s17_s24 = sadd.s32 1, %s586_s24  }
 0x267   : > { %p14_p4 = scmp.ge.s32.totalorder %s17_s24, 5  }
 0x269   :  { %16 = sbr.rel (!%p14_p4) target bundleno = 1 (0x1), region = 78 }

</bundles_post_ra>
